<compile_context>
chip_gen: v7x
topology: tpu7x:2x2x1
jax: 0.10.0
libtpu: 0.0.40
codegen_flags: <defaults>
</compile_context>

<pallas_src>
import jax
import jax.numpy as jnp
from jax.experimental import pallas as pl
from jax.experimental.pallas import tpu as pltpu

EPS = 1e-6


def _round_up(x, m):
    return ((x + m - 1) // m) * m


def _vmem_limit_bytes():
    """Generation-aware scoped-VMEM limit (~75% of physical VMEM)."""
    try:
        cap = pltpu.get_tpu_info().vmem_capacity_bytes
    except Exception:  # pragma: no cover - conservative fallback
        cap = 64 * 1024 * 1024
    return max(32 * 1024 * 1024, min(int(cap) * 3 // 4, 112 * 1024 * 1024))


def _layer_norm_f32(x, a2, b2):
    """Unbiased-std LayerNorm (torch.std semantics), one-pass moments, f32."""
    d = x.shape[-1]
    s = jnp.sum(x, axis=-1, keepdims=True)
    sq = jnp.sum(x * x, axis=-1, keepdims=True)
    mean = s * (1.0 / d)
    var = jnp.maximum((sq - s * mean) * (1.0 / (d - 1)), 0.0)  # guard cancellation
    inv_std = pl.reciprocal(jnp.sqrt(var) + EPS, approx=True)  # EUP slot
    return a2 * ((x - mean) * inv_std) + b2


def _sublayer_kernel_resident(x_ref, a2_ref, b2_ref, w_ref, wb_ref, o_ref):
    """Path A: full (D, D) bf16 weight resident in VMEM; 1-D grid over rows."""
    x = x_ref[...].astype(jnp.float32)                       # (tm, D)
    normed = _layer_norm_f32(x, a2_ref[...], b2_ref[...])
    sub = jnp.dot(normed.astype(jnp.bfloat16), w_ref[...],
                  preferred_element_type=jnp.float32) + wb_ref[...]
    # dropout (eval mode: identity) + residual
    o_ref[...] = (x + sub).astype(o_ref.dtype)


def _sublayer_kernel_tiled(x_ref, a2_ref, b2_ref, w_ref, wb_ref, o_ref, normed_ref):
    """Path B: weight streamed in (D, tn) column blocks; grid = (rows, N tiles).

    The x row block has a constant index along the (inner) N axis, so it stays
    resident; LayerNorm is computed once per row tile (at j == 0) into a bf16
    VMEM scratch and reused for every weight column block.
    """
    j = pl.program_id(1)
    tn = o_ref.shape[-1]

    @pl.when(j == 0)
    def _():
        x = x_ref[...].astype(jnp.float32)
        normed_ref[...] = _layer_norm_f32(
            x, a2_ref[...], b2_ref[...]).astype(normed_ref.dtype)

    col0 = pl.multiple_of(j * tn, 128)
    x_cols = x_ref[:, pl.ds(col0, tn)].astype(jnp.float32)   # residual slice
    sub = jnp.dot(normed_ref[...], w_ref[...],
                  preferred_element_type=jnp.float32) + wb_ref[...]
    o_ref[...] = (x_cols + sub).astype(o_ref.dtype)


def sublayer_connection(x, a_2, b_2, w, wb, *, tile_m=None, tile_n=None):
    """x: [B, S, D]; a_2, b_2, wb: [D]; w: [D, D].  Output dtype == x.dtype."""
    B, S, D = x.shape
    assert D >= 2, "unbiased std needs at least 2 features"
    M = B * S

    xbytes = x.dtype.itemsize
    row_align = 16 if xbytes < 4 else 8

    vmem_limit = _vmem_limit_bytes()
    budget = vmem_limit - (6 << 20)          # headroom for Mosaic internals

    x2 = x.reshape(M, D)
    a2 = a_2.reshape(1, D).astype(jnp.float32)
    b2 = b_2.reshape(1, D).astype(jnp.float32)
    wb2 = wb.reshape(1, D).astype(jnp.float32)
    wf = w.astype(jnp.bfloat16)              # MXU operand, half the VMEM/DMA

    # Resident-weight footprint (default double buffering, bf16).
    w_resident = 2 * D * D * 2
    use_tiled = (tile_n is not None) or (
        w_resident > budget // 2 and D % 128 == 0 and D > 128)

    if use_tiled:
        tn = tile_n if tile_n is not None else next(
            t for t in (512, 256, 128) if D % t == 0)
        assert D % tn == 0 and tn % 128 == 0, "tile_n must divide D and be a multiple of 128"
        fixed = 2 * D * tn * 2 + 8 * D * 4                   # streamed W blocks + LN params
        per_row = 2 * D * xbytes + 2 * tn * xbytes + D * 2   # x + out bufs + normed scratch
    else:
        tn = D
        fixed = w_resident + 8 * D * 4
        per_row = 2 * D * xbytes + 2 * D * xbytes            # x + out (double-buffered)

    # Largest row tile that fits the VMEM budget, capped (default 1024 rows),
    # then capped so the row grid has >= 2 steps (both v7x TensorCores busy).
    tm_cap = tile_m if tile_m is not None else 1024
    tm_budget = (budget - fixed) // per_row if budget > fixed else row_align
    tm = min(tm_cap, max(row_align, tm_budget))
    tm = min(tm, _round_up(pl.cdiv(M, 2), row_align))
    tm = max(row_align, (tm // row_align) * row_align)

    grid_rows = pl.cdiv(M, tm)   # ragged last block handled by Pallas masking

    if not use_tiled:
        out = pl.pallas_call(
            _sublayer_kernel_resident,
            out_shape=jax.ShapeDtypeStruct((M, D), x.dtype),
            grid_spec=pltpu.PrefetchScalarGridSpec(
                num_scalar_prefetch=0,
                grid=(grid_rows,),
                in_specs=[
                    pl.BlockSpec((tm, D), lambda i: (i, 0)),     # x rows (streamed)
                    pl.BlockSpec((1, D), lambda i: (0, 0)),      # a_2 (grid-invariant)
                    pl.BlockSpec((1, D), lambda i: (0, 0)),      # b_2
                    pl.BlockSpec((D, D), lambda i: (0, 0)),      # W  (resident bf16)
                    pl.BlockSpec((1, D), lambda i: (0, 0)),      # wb
                ],
                out_specs=pl.BlockSpec((tm, D), lambda i: (i, 0)),
            ),
            compiler_params=pltpu.CompilerParams(
                dimension_semantics=("parallel",),
                vmem_limit_bytes=vmem_limit,
            ),
        )(x2, a2, b2, wf, wb2)
    else:
        out = pl.pallas_call(
            _sublayer_kernel_tiled,
            out_shape=jax.ShapeDtypeStruct((M, D), x.dtype),
            grid_spec=pltpu.PrefetchScalarGridSpec(
                num_scalar_prefetch=0,
                grid=(grid_rows, D // tn),
                in_specs=[
                    pl.BlockSpec((tm, D), lambda i, j: (i, 0)),  # x rows (resident over j)
                    pl.BlockSpec((1, D), lambda i, j: (0, 0)),   # a_2
                    pl.BlockSpec((1, D), lambda i, j: (0, 0)),   # b_2
                    pl.BlockSpec((D, tn), lambda i, j: (0, j)),  # W column block (streamed)
                    pl.BlockSpec((1, tn), lambda i, j: (0, j)),  # wb column block
                ],
                out_specs=pl.BlockSpec((tm, tn), lambda i, j: (i, j)),
                scratch_shapes=[pltpu.VMEM((tm, D), jnp.bfloat16)],  # cached normed(x)
            ),
            compiler_params=pltpu.CompilerParams(
                dimension_semantics=("parallel", "arbitrary"),
                vmem_limit_bytes=vmem_limit,
            ),
        )(x2, a2, b2, wf, wb2)

    return out.reshape(B, S, D)


def _reference(x, a_2, b_2, w, wb):
    # Pure-JAX reference mirroring the PyTorch forward (eval mode), full f32.
    xf = x.astype(jnp.float32)
    d = xf.shape[-1]
    mean = jnp.mean(xf, axis=-1, keepdims=True)
    diff = xf - mean
    std = jnp.sqrt(jnp.sum(diff * diff, axis=-1, keepdims=True) / (d - 1))
    normed = a_2 * diff / (std + EPS) + b_2
    sub = normed @ w.astype(jnp.float32) + wb
    return (xf + sub).astype(x.dtype)


if __name__ == "__main__":
    key = jax.random.PRNGKey(0)
    k1, k2, k3, k4 = jax.random.split(key, 4)

    def make_params(D, kw):
        a_2 = jnp.ones((D,), jnp.float32)
        b_2 = jnp.zeros((D,), jnp.float32)
        w = jax.random.normal(kw, (D, D), jnp.float32) * (1.0 / jnp.sqrt(D))
        wb = jnp.zeros((D,), jnp.float32)
        return a_2, b_2, w, wb

    # 1) Resident-weight path, f32 I/O.
    D = 128
    a_2, b_2, w, wb = make_params(D, k1)
    x = jax.random.normal(k2, (2, 8, D), dtype=jnp.float32)
    out = jax.block_until_ready(sublayer_connection(x, a_2, b_2, w, wb))
    ref = _reference(x, a_2, b_2, w, wb)
    assert out.shape == x.shape
    assert jnp.allclose(out, ref, atol=3e-2, rtol=3e-2)

    # 2) Ragged row count (M not a multiple of the row tile): partial last block.
    x_r = jax.random.normal(k3, (2, 5, D), dtype=jnp.float32)
    out_r = jax.block_until_ready(sublayer_connection(x_r, a_2, b_2, w, wb))
    ref_r = _reference(x_r, a_2, b_2, w, wb)
    assert out_r.shape == x_r.shape
    assert jnp.allclose(out_r, ref_r, atol=3e-2, rtol=3e-2)

    # 3) bf16 streaming I/O (f32 math in-kernel, output dtype follows input).
    x_bf = x.astype(jnp.bfloat16)
    out_bf = jax.block_until_ready(sublayer_connection(x_bf, a_2, b_2, w, wb))
    ref_bf = _reference(x_bf, a_2, b_2, w, wb)
    assert out_bf.dtype == jnp.bfloat16
    assert jnp.allclose(out_bf.astype(jnp.float32), ref_bf.astype(jnp.float32),
                        atol=1.5e-1, rtol=1e-1)

    # 4) Weight-tiled path (forced small tile_n to exercise it at small D).
    D2 = 256
    a_2b, b_2b, w2, wb_2 = make_params(D2, k4)
    x2 = jax.random.normal(k2, (2, 8, D2), dtype=jnp.float32)
    out2 = jax.block_until_ready(
        sublayer_connection(x2, a_2b, b_2b, w2, wb_2, tile_n=128))
    ref2 = _reference(x2, a_2b, b_2b, w2, wb_2)
    assert jnp.allclose(out2, ref2, atol=3e-2, rtol=3e-2)

    print("KERNEL_OK")
</pallas_src>

<mosaic_0001>
module attributes {stable_mosaic.version = 11 : i64} {
  func.func @_sublayer_kernel_resident(%arg0: i32, %arg1: memref<8x128xf32, #tpu.memory_space<vmem>>, %arg2: memref<1x128xf32, #tpu.memory_space<vmem>>, %arg3: memref<1x128xf32, #tpu.memory_space<vmem>>, %arg4: memref<128x128xbf16, #tpu.memory_space<vmem>>, %arg5: memref<1x128xf32, #tpu.memory_space<vmem>>, %arg6: memref<8x128xf32, #tpu.memory_space<vmem>>) attributes {dimension_semantics = [#tpu.dimension_semantics<parallel>], iteration_bounds = array<i64: 2>, scalar_prefetch = 0 : i64, scratch_operands = 0 : i64, tpu.core_type = #tpu.core_type<tc>, window_params = [{transform_indices = @transform_0, window_bounds = array<i64: 8, 128>}, {pipeline_mode = #tpu.pipeline_mode<synchronous>, transform_indices = @transform_1, window_bounds = array<i64: 1, 128>}, {pipeline_mode = #tpu.pipeline_mode<synchronous>, transform_indices = @transform_2, window_bounds = array<i64: 1, 128>}, {pipeline_mode = #tpu.pipeline_mode<synchronous>, transform_indices = @transform_3, window_bounds = array<i64: 128, 128>}, {pipeline_mode = #tpu.pipeline_mode<synchronous>, transform_indices = @transform_4, window_bounds = array<i64: 1, 128>}, {transform_indices = @transform_5, window_bounds = array<i64: 8, 128>}]} {
    %c0 = arith.constant 0 : index
    %c0_0 = arith.constant 0 : index
    %0 = vector.load %arg1[%c0, %c0_0] : memref<8x128xf32, #tpu.memory_space<vmem>>, vector<8x128xf32>
    %c0_1 = arith.constant 0 : index
    %c0_2 = arith.constant 0 : index
    %1 = vector.load %arg2[%c0_1, %c0_2] : memref<1x128xf32, #tpu.memory_space<vmem>>, vector<1x128xf32>
    %c0_3 = arith.constant 0 : index
    %c0_4 = arith.constant 0 : index
    %2 = vector.load %arg3[%c0_3, %c0_4] : memref<1x128xf32, #tpu.memory_space<vmem>>, vector<1x128xf32>
    %cst = arith.constant dense<0.000000e+00> : vector<8xf32>
    %3 = vector.multi_reduction <add>, %0, %cst [1] : vector<8x128xf32> to vector<8xf32>
    %4 = vector.shape_cast %3 : vector<8xf32> to vector<8x1xf32>
    %5 = arith.mulf %0, %0 : vector<8x128xf32>
    %cst_5 = arith.constant dense<0.000000e+00> : vector<8xf32>
    %6 = vector.multi_reduction <add>, %5, %cst_5 [1] : vector<8x128xf32> to vector<8xf32>
    %7 = vector.shape_cast %6 : vector<8xf32> to vector<8x1xf32>
    %cst_6 = arith.constant 7.812500e-03 : f32
    %8 = vector.broadcast %cst_6 : f32 to vector<8x1xf32>
    %9 = arith.mulf %4, %8 : vector<8x1xf32>
    %10 = arith.mulf %4, %9 : vector<8x1xf32>
    %11 = arith.subf %7, %10 : vector<8x1xf32>
    %cst_7 = arith.constant 0.00787401571 : f32
    %12 = vector.broadcast %cst_7 : f32 to vector<8x1xf32>
    %13 = arith.mulf %11, %12 : vector<8x1xf32>
    %cst_8 = arith.constant 0.000000e+00 : f32
    %14 = vector.broadcast %cst_8 : f32 to vector<8x1xf32>
    %15 = arith.maximumf %13, %14 : vector<8x1xf32>
    %16 = math.sqrt %15 : vector<8x1xf32>
    %cst_9 = arith.constant 9.99999997E-7 : f32
    %17 = vector.broadcast %cst_9 : f32 to vector<8x1xf32>
    %18 = arith.addf %16, %17 : vector<8x1xf32>
    %19 = tpu.reciprocal %18 {approx = true} : vector<8x1xf32> -> vector<8x1xf32>
    %20 = vector.broadcast %9 : vector<8x1xf32> to vector<8x128xf32>
    %21 = arith.subf %0, %20 : vector<8x128xf32>
    %22 = vector.broadcast %19 : vector<8x1xf32> to vector<8x128xf32>
    %23 = arith.mulf %21, %22 : vector<8x128xf32>
    %24 = vector.broadcast %1 : vector<1x128xf32> to vector<8x128xf32>
    %25 = arith.mulf %24, %23 : vector<8x128xf32>
    %26 = vector.broadcast %2 : vector<1x128xf32> to vector<8x128xf32>
    %27 = arith.addf %25, %26 : vector<8x128xf32>
    %28 = arith.truncf %27 : vector<8x128xf32> to vector<8x128xbf16>
    %c0_10 = arith.constant 0 : index
    %c0_11 = arith.constant 0 : index
    %29 = vector.load %arg4[%c0_10, %c0_11] : memref<128x128xbf16, #tpu.memory_space<vmem>>, vector<128x128xbf16>
    %cst_12 = arith.constant dense<0.000000e+00> : vector<8x128xf32>
    %30 = tpu.matmul %28, %29, %cst_12 {dimension_numbers = #tpu.dot_dimension_numbers<[1], [0], [0], [1], [0, 0, 1, 1], [], []>} : vector<8x128xbf16>, vector<128x128xbf16>, vector<8x128xf32> -> vector<8x128xf32>
    %c0_13 = arith.constant 0 : index
    %c0_14 = arith.constant 0 : index
    %31 = vector.load %arg5[%c0_13, %c0_14] : memref<1x128xf32, #tpu.memory_space<vmem>>, vector<1x128xf32>
    %32 = vector.broadcast %31 : vector<1x128xf32> to vector<8x128xf32>
    %33 = arith.addf %30, %32 : vector<8x128xf32>
    %34 = arith.addf %0, %33 : vector<8x128xf32>
    %c0_15 = arith.constant 0 : index
    %c0_16 = arith.constant 0 : index
    %35 = vector.load %arg6[%c0_15, %c0_16] : memref<8x128xf32, #tpu.memory_space<vmem>>, vector<8x128xf32>
    tpu.vector_store %arg6[%c0_15, %c0_16], %34 {strides = array<i32>} : memref<8x128xf32, #tpu.memory_space<vmem>>, vector<8x128xf32>,
    return
  }
  func.func @transform_0(%arg0: i32) -> (i32, i32) {
    %c0_i32 = arith.constant 0 : i32
    %c0_i32_0 = arith.constant 0 : i32
    return %arg0, %c0_i32 : i32, i32
  }
  func.func @transform_1(%arg0: i32) -> (i32, i32) {
    %c0_i32 = arith.constant 0 : i32
    %c0_i32_0 = arith.constant 0 : i32
    %c0_i32_1 = arith.constant 0 : i32
    return %c0_i32, %c0_i32_0 : i32, i32
  }
  func.func @transform_2(%arg0: i32) -> (i32, i32) {
    %c0_i32 = arith.constant 0 : i32
    %c0_i32_0 = arith.constant 0 : i32
    %c0_i32_1 = arith.constant 0 : i32
    return %c0_i32, %c0_i32_0 : i32, i32
  }
  func.func @transform_3(%arg0: i32) -> (i32, i32) {
    %c0_i32 = arith.constant 0 : i32
    %c0_i32_0 = arith.constant 0 : i32
    %c0_i32_1 = arith.constant 0 : i32
    return %c0_i32, %c0_i32_0 : i32, i32
  }
  func.func @transform_4(%arg0: i32) -> (i32, i32) {
    %c0_i32 = arith.constant 0 : i32
    %c0_i32_0 = arith.constant 0 : i32
    %c0_i32_1 = arith.constant 0 : i32
    return %c0_i32, %c0_i32_0 : i32, i32
  }
  func.func @transform_5(%arg0: i32) -> (i32, i32) {
    %c0_i32 = arith.constant 0 : i32
    %c0_i32_0 = arith.constant 0 : i32
    return %arg0, %c0_i32 : i32, i32
  }
}

</mosaic_0001>

<bundles_post_ra>
// kernel: tpu_custom_call.1
= control target key start
LH: loop header
LB: loop body
LE: loop exit
PB: predicated region body
PF: predicated region fallthrough
CT: control target
= control target key end

     0   :  { %10 = vsyncpa [#allocation3], 0  ;;  %s1012_s0 = inlined_call_operand.hbm [shape: f32[16,128], index: 0, kind: input, shape index: {}]   ;;  %s1013_s1 = inlined_call_operand.vmem [shape: f32[1,128], index: 1, kind: input, shape index: {}]   ;;  %s1014_s2 = inlined_call_operand.vmem [shape: f32[1,128], index: 2, kind: input, shape index: {}]   ;;  %s1015_s3 = inlined_call_operand.hbm [shape: bf16[128,128], index: 3, kind: input, shape index: {}]   ;;  %s1016_s4 = inlined_call_operand.vmem [shape: f32[1,128], index: 4, kind: input, shape index: {}]   ;;  %s1017_s5 = inlined_call_operand.hbm [shape: f32[16,128], index: 5, kind: output, shape index: {}]  }
   0x1   :  { %12 = vsyncpa [#allocation3 + $0x1], 0 }
   0x2   :  { %13 = vsyncpa [#allocation6], 0 }
   0x3   :  { %14 = vsyncpa [#allocation4], 0 }
   0x4   :  { %16 = vsyncpa [#allocation4 + $0x1], 0  ;;  %s796_s18 = smov 0   ;;  %s798_s19 = smov 0  }
   0x5   :  { %s800_s20 = smov 0   ;;  %s802_s21 = smov 0  }
   0x6 LB: > { %s817_s22 = sadd.s32 4294967295, %s757_s21   ;;  %s502_s23 = sadd.s32 4294967294, %s757_s21   ;;  %s757_s21 = sphi %s802_s21, %s1037_s21   ;;  %s753_s20 = sphi %s800_s20, %s1036_s20   ;;  %s749_s19 = sphi %s798_s19, %s1035_s19   ;;  %s745_s18 = sphi %s796_s18, %s1034_s18  }
   0x7   : > { %p42_p0 = scmp.ne.s32.totalorder %s749_s19, %s745_s18  ;;  %p1018_p1 = scmp.eq.s32.totalorder %s817_s22, 0 }
   0x8   : > { %p156_p3 = scmp.eq.s32.totalorder %s502_s23, 1  ;;  %p503_p5 = scmp.ge.s32.totalorder %s757_s21, 1 }
   0x9   : > { %p826_p4 = por %p1018_p1, %p42_p0  ;;  %p163_p7 = scmp.lt.s32.totalorder %s757_s21, 3 }
   0xa   : > { %p831_p6 = por %p156_p3, %p42_p0  ;;  %s759_s27 = smov [#allocation5]  }
   0xb   : > { %s1021_s24 = scalar_select %p826_p4, 1, 0 }
   0xc   : > { %s1022_s25 = scalar_select %p831_p6, 1, 0 }
   0xd   : > { %p836_p8 = pnand %p503_p5, %p163_p7  ;;  %s181_s28 = sshll.u32 %s759_s27, 4  ;;  %s840_s28 = int_to_ptr.vmem [resolvable:$true] %s181_s28 }
   0xe   : > { %s852_s30 = sadd.s32 1, %s757_s21   ;;  %s29_s6 = sadd.s32 1, %s753_s20 }
   0xf   : > { %s1023_s26 = scalar_select %p836_p8, 1, 0 }
  0x10   : > { %p564_p9 = pneg %p836_p8  ;;  %s26_s7 = ssub.s32 %s757_s21, %s852_s30 }
  0x11   : > { %s629_s10 = scalar_lea.hbm %s1015_s3, 1024 }
  0x12   : > { %p847_p11 = pnand %p564_p9, %p1018_p1  ;;  %p630_p12 = scmp.ne.s32.totalorder %s1015_s3, %s629_s10 }
  0x13   : > { %p636_p5 = scmp.lt.u32.totalorder %s629_s10, %s1015_s3 }
  0x14   : > { %p631_p13 = pneg %p847_p11 }
  0x16   : > { %p632_p0 = pnand %p631_p13, %p630_p12 }
  0x18   : > { %p633_p3 = pneg %p632_p0 }
  0x1a   : > { %p638_p7 = pnand %p636_p5, %p633_p3 }
  0x1c   : > { %641 = shalt.err (!%p638_p7)
}
  0x1d   : > { %s642_s15 = scalar_lea.vmem %s840_s28, 1024  ;;  %p650_p2 = scmp.lt.s32.totalorder %s840_s28, %s840_s28 }
  0x1e   : > { %p643_p9 = scmp.ne.s32.totalorder %s840_s28, %s642_s15  ;;  %p651_p6 = scmp.lt.s32.totalorder %s642_s15, %s642_s15 }
  0x20   : > { %p645_p10 = pnand %p643_p9, %p631_p13  ;;  %p652_p4 = por %p651_p6, %p650_p2 }
  0x22   : > { %p646_p1 = pneg %p645_p10 }
  0x24   : > { %p653_p8 = pnand %p652_p4, %p646_p1 }
  0x26   : > { %656 = shalt.err (!%p653_p8)
}
  0x27   : > { %s760_s16 = smov 64   ;;  %s761_s17 = smov 4  }
  0x28   : > { %567 = dma.hbm_to_vmem [thread:$0]  (!%p847_p11), %s1015_s3, 1024, %s840_s28, [#allocation6], %s760_s16, %s760_s16, %s761_s17  }
  0x29   : > { %p27_p2 = scmp.eq.s32.totalorder %s26_s7, 0  ;;  %p36_p1 = scmp.ne.s32.totalorder %s753_s20, %s749_s19 }
  0x2a   : > { %p37_p4 = scmp.eq.s32.totalorder %s757_s21, 0  ;;  %p577_p6 = scmp.lt.s32.totalorder %s757_s21, 2 }
  0x2b   : > { %s883_s8 = scalar_select %p27_p2, %s753_s20, %s29_s6  }
  0x2c   : > { %p38_p8 = por %p37_p4, %p36_p1  ;;  %p1025_p10 = scmp.eq.s32.totalorder %s817_s22, 1 }
  0x2d   : > { %s198_s10 = sand.u32 1, %s753_s20   ;;  %s507_s11 = sshll.u32 %s757_s21, 7 }
  0x2e   : > { %p887_p12 = por %p1025_p10, %p36_p1  ;;  %s506_s12 = sshll.u32 %s198_s10, 3 }
  0x2f   : > { %s896_s14 = scalar_lea.hbm %s1012_s0, %s507_s11  ;;  %s202_s28 = scalar_lea.vmem [#allocation2], %s506_s12 }
  0x30   : > { %s209_s6 = sshll.u32 %s202_s28, 4  ;;  %p898_p11 = pnand %p577_p6, %p38_p8  ;;  %s902_s6 = int_to_ptr.vmem [resolvable:$true] %s209_s6 }
  0x31   : > { %s199_s15 = scalar_lea.sflag [#allocation3], %s198_s10  ;;  %s657_s16 = scalar_lea.hbm %s896_s14, 128 }
  0x32   : > { %p658_p13 = scmp.ne.s32.totalorder %s896_s14, %s657_s16  ;;  %p659_p0 = pneg %p898_p11 }
  0x33   : > { %s662_s27 = scalar_lea.hbm %s1012_s0, 256  ;;  %p663_p7 = scmp.lt.u32.totalorder %s896_s14, %s1012_s0 }
  0x34   : > { %p660_p3 = pnand %p659_p0, %p658_p13  ;;  %p664_p9 = scmp.lt.u32.totalorder %s662_s27, %s657_s16 }
  0x35   : > { %p666_p1 = scmp.lt.u32.totalorder %s657_s16, %s896_s14 }
  0x36   : > { %p661_p5 = pneg %p660_p3  ;;  %p665_p2 = por %p664_p9, %p663_p7 }
  0x38   : > { %p667_p4 = por %p666_p1, %p665_p2 }
  0x3a   : > { %p668_p6 = pnand %p667_p4, %p661_p5 }
  0x3c   : > { %671 = shalt.err (!%p668_p6)
}
  0x3d   : > { %s672_s10 = scalar_lea.vmem %s902_s6, 128  ;;  %s762_s29 = smov [#allocation2]  }
  0x3e   : > { %p673_p8 = scmp.ne.s32.totalorder %s902_s6, %s672_s10  ;;  %s677_s13 = sshll.u32 %s762_s29, 4  ;;  %s678_s13 = int_to_ptr.vmem [resolvable:$false] %s677_s13 }
  0x3f   : > { %s679_s28 = scalar_lea.vmem %s678_s13, 256  ;;  %p680_p3 = scmp.lt.s32.totalorder %s902_s6, %s678_s13 }
  0x40   : > { %p675_p10 = pnand %p673_p8, %p659_p0  ;;  %p681_p7 = scmp.lt.s32.totalorder %s679_s28, %s672_s10 }
  0x42   : > { %p676_p13 = pneg %p675_p10  ;;  %p682_p9 = por %p681_p7, %p680_p3 }
  0x44   : > { %p683_p2 = pnand %p682_p9, %p676_p13 }
  0x46   : > { %686 = shalt.err (!%p683_p2)
}
  0x47   : > { %571 = dma.hbm_to_vmem [thread:$0]  (!%p898_p11), %s896_s14, 128, %s902_s6, %s199_s15  }
  0x48   : > { %p1028_p5 = scmp.ne.s32.totalorder %s1023_s26, 0 }
  0x49   : > { %s932_s16 = sand.u32 (!%p1028_p5), 1, %s749_s19   ;;  %p1029_p0 = scmp.ne.s32.totalorder (!%p1028_p5), %s1021_s24, 0 }
  0x4a   : > { %218 = sbr.rel (%p1028_p5) target bundleno = 504 (0x1f8), region = 40  ;;  %s509_s17 = sshll.u32 (!%p1028_p5), %s932_s16, 3 }
  0x4b   : > { %s221_s23 = scalar_lea.sflag (!%p1028_p5), [#allocation3], %s932_s16  ;;  %s224_s27 = scalar_lea.vmem (!%p1028_p5), [#allocation2], %s509_s17 }
  0x51   : > { %732 = dma.done.wait (%p1029_p0), %s221_s23, 128  }
  0x52   : > { %734 = vsyncadd (%p1029_p0), %s221_s23, 4294967168  ;;  %p1030_p11 = scmp.eq.s32.totalorder %s817_s22, 0 }
  0x54   : > { %736 = dma.done.wait (%p1030_p11), [#allocation6], 1024   ;;  %p1031_p1 = pmov %p1030_p11 }
  0x55   : > { %v946_v0 = vld [vmem:[%s224_s27] sm:$0xff]  ;;  %v617_v2 = vld [vmem:[#allocation5] sm:$0xff]   ;;  %v763_v3 = vmov 0.0   ;;  %v618_v4 = vld [vmem:[#allocation5 + $0x8] sm:$0xff]   ;;  %vm764_vm0 = vmmov 0   ;;  %s524_s11 = sshll.u32 %s817_s22, 7 }
  0x56   : > { %738 = vsyncadd (%p1031_p1), [#allocation6], 4294966272  ;;  %259 = vadd.xlane.f32.xlu0 %v946_v0  ;;  %v261_v1 = vmul.f32 %v946_v0, %v946_v0  ;;  %536 = vmatprep.subr.bf16.mxu0 %v763_v3  ;;  %v619_v5 = vld [vmem:[#allocation5 + $0x10] sm:$0xff]   ;;  %v620_v6 = vld [vmem:[#allocation5 + $0x18] sm:$0xff]   ;;  %s254_s12 = scalar_lea.vmem [#allocation7], %s509_s17  ;;  %s968_s28 = scalar_lea.hbm %s1017_s5, %s524_s11 }
  0x57   : > { %537 = vmatpush3.bf16.msra.mxu0 %v617_v2  ;;  %552 = vmatprep.mubr.msk.bf16.mxu0 %vm764_vm0, %v763_v3  ;;  %v621_v7 = vld [vmem:[#allocation5 + $0x20] sm:$0xff]   ;;  %v622_v8 = vld [vmem:[#allocation5 + $0x28] sm:$0xff]   ;;  %v623_v9 = vld [vmem:[#allocation5 + $0x30] sm:$0xff]   ;;  %s422_s10 = sshll.u32 %s254_s12, 4  ;;  %s409_s22 = scalar_lea.sflag [#allocation4], %s932_s16  ;;  %s970_s10 = int_to_ptr.vmem [resolvable:$true] %s422_s10 }
  0x58   : > { %538 = vmatprep.subr.bf16.mxu0 %v763_v3  ;;  %v624_v10 = vld [vmem:[#allocation5 + $0x38] sm:$0xff]   ;;  %v512_v26 = vld [vmem:[%s1013_s1] ss:$0 sm:$0xff]  ;;  %s687_s17 = scalar_lea.vmem %s970_s10, 128  ;;  %s765_s23 = smov [#allocation7]  }
  0x59   : > { %v513_v28 = vld [vmem:[%s1014_s2] ss:$0 sm:$0xff]  ;;  %p688_p4 = scmp.ne.s32.totalorder %s970_s10, %s687_s17  ;;  %s691_s27 = sshll.u32 %s765_s23, 4  ;;  %s692_s27 = int_to_ptr.vmem [resolvable:$false] %s691_s27 }
  0x5a   : > { %262 = vadd.xlane.f32.xlu0 %v261_v1  ;;  %v514_v32 = vld [vmem:[%s1016_s4] ss:$0 sm:$0xff]  ;;  %s693_s24 = scalar_lea.vmem %s692_s27, 256  ;;  %p694_p10 = scmp.lt.s32.totalorder %s970_s10, %s692_s27 }
  0x5b   : > { %539 = vmatpush3.bf16.msra.mxu0 %v618_v4  ;;  %p689_p6 = pnand %p688_p4, %p887_p12  ;;  %p695_p13 = scmp.lt.s32.totalorder %s693_s24, %s687_s17 }
  0x5c   : > { %540 = vmatprep.subr.bf16.mxu0 %v763_v3 }
  0x5d   : > { %p690_p8 = pneg %p689_p6  ;;  %p696_p3 = por %p695_p13, %p694_p10 }
  0x5f   : > { %541 = vmatpush3.bf16.msra.mxu0 %v619_v5  ;;  %p697_p7 = pnand %p696_p3, %p690_p8 }
  0x60   : > { %542 = vmatprep.subr.bf16.mxu0 %v763_v3 }
  0x63   : > { %543 = vmatpush3.bf16.msra.mxu0 %v620_v6 }
  0x64   : > { %544 = vmatprep.subr.bf16.mxu0 %v763_v3 }
  0x67   : > { %545 = vmatpush3.bf16.msra.mxu0 %v621_v7 }
  0x68   : > { %546 = vmatprep.subr.bf16.mxu0 %v763_v3 }
  0x6b   : > { %547 = vmatpush3.bf16.msra.mxu0 %v622_v8 }
  0x6c   : > { %548 = vmatprep.subr.bf16.mxu0 %v763_v3 }
  0x6f   : > { %549 = vmatpush3.bf16.msra.mxu0 %v623_v9 }
  0x70   : > { %550 = vmatprep.subr.bf16.mxu0 %v763_v3 }
  0x73   : > { %551 = vmatpush3.bf16.msra.mxu0 %v624_v10 }
  0xe3   : > { %v260_v11 = vpop.xlane.xlu0 %259 }
  0xe4   : > { %v264_v12 = vmul.f32 0.0078125, %v260_v11 }
  0xe6   : > { %v265_v13 = vmul.f32 %v264_v12, %v260_v11  ;;  %v278_v24 = vsub.f32 %v946_v0, %v264_v12 }
  0xe7   : > { %v263_v14 = vpop.xlane.xlu0 %262 }
  0xe8   : > { %v266_v15 = vsub.f32 %v263_v14, %v265_v13 }
  0xea   : > { %v267_v16 = vmul.f32 0.007874016, %v266_v15 }
  0xec   : > { %v268_v17 = vmax.f32 %v267_v16, 0.0 }
  0xee   : > { %625 = vrsqrt.f32 %v268_v17  ;;  %vm271_vm1 = vcmp.eq.f32.partialorder %v268_v17, inf  ;;  %v274_v20 = vand.u32 2147483648, %v268_v17  ;;  %vm273_vm2 = vcmp.eq.f32.partialorder %v268_v17, 0.0 }
  0xf8   : > { %v626_v18 = vpop.eup %625 }
  0xf9   : > { %v270_v19 = vmul.f32 %v626_v18, %v268_v17 }
  0xfb   : > { %v272_v21 = vsel %vm271_vm1, %v268_v17, %v270_v19 }
  0xfc   : > { %v275_v22 = vsel %vm273_vm2, %v274_v20, %v272_v21 }
  0xfd   : > { %v276_v23 = vadd.f32 1e-06, %v275_v22 }
  0xff   : > { %627 = vrcp.f32 %v276_v23 }
 0x109   : > { %v628_v25 = vpop.eup %627 }
 0x10a   : > { %v279_v27 = vmul.f32 %v628_v25, %v278_v24 }
 0x10c   : > { %v286_v29 = vmul.f32 %v512_v26, %v279_v27 }
 0x10e   : > { %v293_v30 = vadd.f32 %v513_v28, %v286_v29 }
 0x110   : > { %v294_v31 = vpack.c.bf16 %v293_v30, %v293_v30 }
 0x112   : > { %553 = vmatmul.mubr.bf16.vlgmr.msra.gmra.mrb[0].mxu0 %v294_v31 }
 0x1e5   : > { %v400_v33 = vpop.f32.mrb[0].mxu0 }
 0x1e6   : > { %v401_v34 = vadd.f32 %v514_v32, %v400_v33  ;;  %v554_v35 = vpop.f32.mrb[1].mxu0 }
 0x1e7   : > { %v403_v36 = vpop.f32.mrb[2].mxu0 }
 0x1e8   : > { %v406_v37 = vadd.f32 %v401_v34, %v946_v0  ;;  %v555_v38 = vpop.f32.mrb[3].mxu0 }
 0x1ea   : > { %407 = vst [vmem:[%s254_s12] sm:$0xff] %v406_v37 }
 0x1eb   : > { %700 = shalt.err (!%p697_p7)
}
 0x1ec   : > { %s701_s16 = scalar_lea.hbm %s968_s28, 128  ;;  %s705_s6 = scalar_lea.hbm %s1017_s5, 256 }
 0x1ed   : > { %p702_p9 = scmp.ne.s32.totalorder %s968_s28, %s701_s16  ;;  %p706_p0 = scmp.lt.u32.totalorder %s968_s28, %s1017_s5 }
 0x1ee   : > { %p707_p11 = scmp.lt.u32.totalorder %s705_s6, %s701_s16  ;;  %p709_p4 = scmp.lt.u32.totalorder %s701_s16, %s968_s28 }
 0x1ef   : > { %p703_p2 = pnand %p702_p9, %p887_p12 }
 0x1f0   : > { %p708_p1 = por %p707_p11, %p706_p0 }
 0x1f1   : > { %p704_p5 = pneg %p703_p2 }
 0x1f2   : > { %p710_p6 = por %p709_p4, %p708_p1 }
 0x1f4   : > { %p711_p8 = pnand %p710_p6, %p704_p5 }
 0x1f6   : > { %714 = shalt.err (!%p711_p8)
}
 0x1f7   : > { %562 = dma.vmem_to_hbm [thread:$0]  (%p887_p12), %s970_s10, 128, %s968_s28, %s409_s22  }
 0x1f8 PF: > { %s434_s11 = sand.u32 1, %s745_s18   ;;  %p1032_p10 = scmp.ne.s32.totalorder %s1022_s25, 0 }
 0x1f9   : > { %p1033_p13 = scmp.ge.s32.totalorder %s757_s21, 2  ;;  %s435_s12 = scalar_lea.sflag [#allocation4], %s434_s11 }
 0x1fb   : > { %p573_p3 = pnand %p1033_p13, %p1032_p10 }
 0x1fd   : > { %740 = dma.done.wait (!%p573_p3), %s435_s12, 128  }
 0x1fe   : > { %742 = vsyncadd (!%p573_p3), %s435_s12, 4294967168  ;;  %p19_p7 = scmp.ge.s32.totalorder %s852_s30, 4   ;;  %s1034_s18 = smov %s749_s19 }
 0x1ff   : > { %s1035_s19 = smov %s753_s20  ;;  %s1036_s20 = smov %s883_s8 }
 0x200   : > { %s1037_s21 = smov %s852_s30  ;;  %21 = sbr.rel (!%p19_p7) target bundleno = 6 (0x6), region = 89 }
 0x207   :  { %440 = vsyncpa [#allocation3], 1 }
 0x208   :  { %442 = vsyncpa [#allocation3 + $0x1], 1 }
 0x209   :  { %443 = vsyncpa [#allocation6], 1 }
 0x20a   :  { %444 = vsyncpa [#allocation4], 1 }
 0x20b   :  { %446 = vsyncpa [#allocation4 + $0x1], 1 }

</bundles_post_ra>
